<compile_context>
chip_gen: v6e
topology: v6e:2x2x1
jax: 0.10.0
libtpu: 0.0.40
codegen_flags: <defaults>
</compile_context>

<pallas_src>
import math

import jax
import jax.numpy as jnp
from jax.experimental import pallas as pl
from jax.experimental.pallas import tpu as pltpu


def _round_up(x, m):
    return ((x + m - 1) // m) * m


def _pad_out_dim(d):
    # Lane-dense output; 256-aligned for the v6e/v7x 256x256 MXU when large.
    if d <= 128:
        return 128
    return _round_up(d, 256)


def _vmem_capacity_bytes():
    try:
        info = pltpu.get_tpu_info()
        cap = getattr(info, "vmem_capacity_bytes", None)
        if cap:
            return int(cap)
    except Exception:
        pass
    return 64 << 20  # conservative (v7x per-TensorCore VMEM)


# ---------------------------------------------------------------------------
# Kernels
# ---------------------------------------------------------------------------

_INV_SQRT2 = 0.7071067811865476


def _adapter_fused_kernel(x_ref, w1_ref, b1_ref, w2_ref, b2_ref, o_ref):
    """gelu(x @ W1 + b1) @ W2 + b2 with the full (padded) hidden dim resident."""
    h = jnp.dot(x_ref[...], w1_ref[...], preferred_element_type=jnp.float32)
    h = h + b1_ref[...]  # b1 already f32
    h = 0.5 * h * (1.0 + jax.lax.erf(h * jnp.float32(_INV_SQRT2)))  # exact GELU
    o = jnp.dot(h.astype(w2_ref.dtype), w2_ref[...],
                preferred_element_type=jnp.float32)
    o_ref[...] = (o + b2_ref[...]).astype(o_ref.dtype)


def _adapter_ktiled_kernel(x_ref, w1_ref, b1_ref, w2_ref, b2_ref, o_ref, acc_ref):
    """One (row-tile, hidden-k-tile) step with a resident f32 accumulator."""
    k = pl.program_id(1)

    @pl.when(k == 0)
    def _():
        acc_ref[...] = jnp.zeros_like(acc_ref)

    h = jnp.dot(x_ref[...], w1_ref[...], preferred_element_type=jnp.float32)
    h = h + b1_ref[...]
    h = 0.5 * h * (1.0 + jax.lax.erf(h * jnp.float32(_INV_SQRT2)))
    acc_ref[...] += jnp.dot(h.astype(w2_ref.dtype), w2_ref[...],
                            preferred_element_type=jnp.float32)

    @pl.when(k == pl.num_programs(1) - 1)
    def _():
        o_ref[...] = (acc_ref[...] + b2_ref[...]).astype(o_ref.dtype)


# ---------------------------------------------------------------------------
# Planner (tile sizes + buffering chosen against the VMEM budget)
# ---------------------------------------------------------------------------

def _fused_footprint(tm, d_in, d_pad, isz, w_bufs):
    weights = w_bufs * ((d_in * d_pad + d_pad * d_pad) * isz + 2 * d_pad * 4)
    acts = 2 * tm * d_in * isz + 2 * tm * d_pad * isz   # x + out, double-buffered
    temp = tm * d_pad * 4                               # f32 hidden activations
    return weights + acts + temp


def _ktiled_footprint(tm, tk, d_in, d_pad, isz, single_kinv):
    xb = 1 if single_kinv else 2
    stream = 2 * (d_in * tk * isz + tk * 4 + tk * d_pad * isz)       # W1, b1, W2
    fixed = xb * (tm * d_in * isz + tm * d_pad * isz + d_pad * 4)    # x, out, b2
    acc = tm * d_pad * 4
    temp = tm * tk * 4
    return stream + fixed + acc + temp


def _plan(M, d_in, d_pad, isz, budget, tm_max, force_mode=None):
    if M <= 256:
        # Single row tile; multiple of 16 (bf16 sublane packing).
        tms = [min(_round_up(max(M, 16), 16), 256)]
    else:
        tm_max = max(256, (int(tm_max) // 256) * 256)   # guard non-aligned tm_max
        cand = [t for t in (1024, 768, 512, 256) if t <= tm_max]
        # Prefer >=2 row tiles so the "parallel" axis can span both v7x cores.
        multi = [t for t in cand if pl.cdiv(M, t) >= 2]
        tms = multi if multi else cand

    if force_mode != "ktiled":
        # Fused (weights resident, streamed from HBM once). Prefer the default
        # double-buffered layout (no pipeline_mode) when it fits; fall back to
        # single-buffered constant weight blocks when VMEM is tight.
        for w_bufs in (2, 1):
            for tm in tms:
                f = _fused_footprint(tm, d_in, d_pad, isz, w_bufs)
                if f <= budget:
                    return {"mode": "fused", "tm": tm,
                            "single_weights": w_bufs == 1, "footprint": f}

    # k-tiled: prefer the largest tm (W2 re-stream traffic ~ 1/tm), then tk.
    for tm in tms:
        for tk in (1024, 512, 256, 128):
            if tk >= d_pad or d_pad % tk:
                continue
            for single in (False, True):
                f = _ktiled_footprint(tm, tk, d_in, d_pad, isz, single)
                if f <= budget:
                    return {"mode": "ktiled", "tm": tm, "tk": tk,
                            "single_kinv": single, "footprint": f}

    # Last resort: smallest legal config, single-buffered k-invariants.
    tm = tms[-1]
    tk = d_pad
    for c in (128, 256, 512):
        if d_pad % c == 0 and c < d_pad:
            tk = c
            break
    return {"mode": "ktiled", "tm": tm, "tk": tk, "single_kinv": True,
            "footprint": _ktiled_footprint(tm, tk, d_in, d_pad, isz, True)}


# ---------------------------------------------------------------------------
# Parameter preparation (hoisted out of the forward path) + forward
# ---------------------------------------------------------------------------

def prepare_image_adapter_params(w1, b1, w2, b2, *, activation_dtype=jnp.float32):
    """Pad D_out to a lane/MXU-friendly width and cast weights ONCE.

    Weights are stored pre-transposed as (D_in, D_out) / (D_out, D_out) so the
    kernel computes x @ W. Biases stay f32 for the in-kernel f32 epilogue.
    """
    d_in, d_out = w1.shape
    d_pad = _pad_out_dim(d_out)
    pad = d_pad - d_out
    w1p = jnp.pad(w1.astype(activation_dtype), ((0, 0), (0, pad)))
    b1p = jnp.pad(b1.astype(jnp.float32), (0, pad)).reshape(1, d_pad)
    w2p = jnp.pad(w2.astype(activation_dtype), ((0, pad), (0, pad)))
    b2p = jnp.pad(b2.astype(jnp.float32), (0, pad)).reshape(1, d_pad)
    return {"w1": w1p, "b1": b1p, "w2": w2p, "b2": b2p, "d_out": d_out}


def image_adapter_forward(vision_outputs, params, *, tm_max=1024, _force_mode=None):
    """vision_outputs: (B, S, D_in); params from prepare_image_adapter_params."""
    w1, b1, w2, b2 = params["w1"], params["b1"], params["w2"], params["b2"]
    d_out = params["d_out"]
    B, S, d_in = vision_outputs.shape
    d_pad = w1.shape[1]
    dtype = vision_outputs.dtype
    if w1.dtype != dtype:  # guard: normally pre-cast at prepare time
        w1 = w1.astype(dtype)
        w2 = w2.astype(dtype)
    isz = jnp.dtype(dtype).itemsize
    M = B * S

    cap = _vmem_capacity_bytes()
    budget = max(cap - (8 << 20), 16 << 20)
    plan = _plan(M, d_in, d_pad, isz, budget, tm_max, _force_mode)
    tm = plan["tm"]

    x2d = vision_outputs.reshape(M, d_in)
    if M <= 256:
        # Single row tile; pad the (small) activations up to the tile.
        m_rows = tm
        if m_rows != M:
            x2d = jnp.pad(x2d, ((0, m_rows - M), (0, 0)))
    else:
        # No activation pad: the ragged last row tile is handled by the
        # pipeline (masked stores); OOB rows are discarded on writeback.
        m_rows = M

    n_row = pl.cdiv(m_rows, tm)
    vmem_limit = int(min(cap, max(plan["footprint"] + (4 << 20), 32 << 20)))

    if plan["mode"] == "fused":
        single_w = plan["single_weights"]

        def wspec(shape):
            if single_w:
                return pl.BlockSpec(shape, lambda i: (0, 0),
                                    pipeline_mode=pl.Buffered(1))
            return pl.BlockSpec(shape, lambda i: (0, 0))

        out2d = pl.pallas_call(
            _adapter_fused_kernel,
            out_shape=jax.ShapeDtypeStruct((m_rows, d_pad), dtype),
            grid_spec=pltpu.PrefetchScalarGridSpec(
                num_scalar_prefetch=0,
                grid=(n_row,),
                in_specs=[
                    pl.BlockSpec((tm, d_in), lambda i: (i, 0)),   # x row-tile
                    wspec((d_in, d_pad)),                         # W1 (resident)
                    wspec((1, d_pad)),                            # b1
                    wspec((d_pad, d_pad)),                        # W2 (resident)
                    wspec((1, d_pad)),                            # b2
                ],
                out_specs=pl.BlockSpec((tm, d_pad), lambda i: (i, 0)),
            ),
            compiler_params=pltpu.CompilerParams(
                dimension_semantics=("parallel",),
                vmem_limit_bytes=vmem_limit,
            ),
        )(x2d, w1, b1, w2, b2)
    else:
        tk = plan["tk"]
        single_k = plan["single_kinv"]

        def kinv_spec(shape, imap):
            if single_k:
                return pl.BlockSpec(shape, imap, pipeline_mode=pl.Buffered(1))
            return pl.BlockSpec(shape, imap)

        out2d = pl.pallas_call(
            _adapter_ktiled_kernel,
            out_shape=jax.ShapeDtypeStruct((m_rows, d_pad), dtype),
            grid_spec=pltpu.PrefetchScalarGridSpec(
                num_scalar_prefetch=0,
                grid=(n_row, d_pad // tk),
                in_specs=[
                    kinv_spec((tm, d_in), lambda i, k: (i, 0)),     # x (k-invariant)
                    pl.BlockSpec((d_in, tk), lambda i, k: (0, k)),  # W1 column-tile
                    pl.BlockSpec((1, tk), lambda i, k: (0, k)),     # b1 chunk
                    pl.BlockSpec((tk, d_pad), lambda i, k: (k, 0)), # W2 row-tile
                    kinv_spec((1, d_pad), lambda i, k: (0, 0)),     # b2 (k-invariant)
                ],
                out_specs=kinv_spec((tm, d_pad), lambda i, k: (i, 0)),
                scratch_shapes=[pltpu.VMEM((tm, d_pad), jnp.float32)],
            ),
            compiler_params=pltpu.CompilerParams(
                dimension_semantics=("parallel", "arbitrary"),
                vmem_limit_bytes=vmem_limit,
            ),
        )(x2d, w1, b1, w2, b2)

    return out2d[:M, :d_out].reshape(B, S, d_out)


# ---------------------------------------------------------------------------
# Synthetic init + reference
# ---------------------------------------------------------------------------

def init_image_adapter_params(key, input_features, output_features,
                              dtype=jnp.float32):
    """Deterministic synthetic init mimicking nn.Linear's uniform(-1/sqrt(in), 1/sqrt(in))."""
    k1, k2, k3, k4 = jax.random.split(key, 4)
    bound1 = 1.0 / math.sqrt(input_features)
    bound2 = 1.0 / math.sqrt(output_features)
    # Stored pre-transposed: (in, out) so the kernel does x @ W.
    w1 = jax.random.uniform(k1, (input_features, output_features),
                            dtype, -bound1, bound1)
    b1 = jax.random.uniform(k2, (output_features,), dtype, -bound1, bound1)
    w2 = jax.random.uniform(k3, (output_features, output_features),
                            dtype, -bound2, bound2)
    b2 = jax.random.uniform(k4, (output_features,), dtype, -bound2, bound2)
    return w1, b1, w2, b2


def _reference_forward(x, w1, b1, w2, b2):
    h = x @ w1 + b1
    h = jax.nn.gelu(h, approximate=False)
    return h @ w2 + b2


if __name__ == "__main__":
    key = jax.random.PRNGKey(0)
    k_x1, k_p1, k_x2, k_p2 = jax.random.split(key, 4)

    # Case 1: small shapes, exercises the fused (weights-resident) path.
    B, S, D_in, D_out = 2, 8, 32, 64
    x1 = jax.random.normal(k_x1, (B, S, D_in), dtype=jnp.float32)
    w1, b1, w2, b2 = init_image_adapter_params(k_p1, D_in, D_out)
    params1 = prepare_image_adapter_params(w1, b1, w2, b2,
                                           activation_dtype=jnp.float32)
    out1 = jax.block_until_ready(image_adapter_forward(x1, params1))
    ref1 = _reference_forward(x1.reshape(-1, D_in), w1, b1, w2, b2).reshape(B, S, D_out)
    assert out1.shape == (B, S, D_out)
    assert jnp.allclose(out1, ref1, atol=1e-5, rtol=1e-5), "fused path mismatch"

    # Case 2: force the k-tiled accumulator path (D_out=320 -> D_pad=512, tk=256).
    B2, S2, D_in2, D_out2 = 2, 8, 48, 320
    x2 = jax.random.normal(k_x2, (B2, S2, D_in2), dtype=jnp.float32)
    w1b, b1b, w2b, b2b = init_image_adapter_params(k_p2, D_in2, D_out2)
    params2 = prepare_image_adapter_params(w1b, b1b, w2b, b2b,
                                           activation_dtype=jnp.float32)
    out2 = jax.block_until_ready(
        image_adapter_forward(x2, params2, _force_mode="ktiled"))
    ref2 = _reference_forward(x2.reshape(-1, D_in2),
                              w1b, b1b, w2b, b2b).reshape(B2, S2, D_out2)
    assert out2.shape == (B2, S2, D_out2)
    assert jnp.allclose(out2, ref2, atol=1e-4, rtol=1e-4), "ktiled path mismatch"

    print("KERNEL_OK")
</pallas_src>

<mosaic_0001>
module attributes {stable_mosaic.version = 11 : i64} {
  func.func @_adapter_fused_kernel(%arg0: i32, %arg1: memref<16x32xf32, #tpu.memory_space<vmem>>, %arg2: memref<32x128xf32, #tpu.memory_space<vmem>>, %arg3: memref<1x128xf32, #tpu.memory_space<vmem>>, %arg4: memref<128x128xf32, #tpu.memory_space<vmem>>, %arg5: memref<1x128xf32, #tpu.memory_space<vmem>>, %arg6: memref<16x128xf32, #tpu.memory_space<vmem>>) attributes {dimension_semantics = [#tpu.dimension_semantics<parallel>], iteration_bounds = array<i64: 1>, scalar_prefetch = 0 : i64, scratch_operands = 0 : i64, tpu.core_type = #tpu.core_type<tc>, window_params = [{transform_indices = @transform_0, window_bounds = array<i64: 16, 32>}, {pipeline_mode = #tpu.pipeline_mode<synchronous>, transform_indices = @transform_1, window_bounds = array<i64: 32, 128>}, {pipeline_mode = #tpu.pipeline_mode<synchronous>, transform_indices = @transform_2, window_bounds = array<i64: 1, 128>}, {pipeline_mode = #tpu.pipeline_mode<synchronous>, transform_indices = @transform_3, window_bounds = array<i64: 128, 128>}, {pipeline_mode = #tpu.pipeline_mode<synchronous>, transform_indices = @transform_4, window_bounds = array<i64: 1, 128>}, {transform_indices = @transform_5, window_bounds = array<i64: 16, 128>}]} {
    %c0 = arith.constant 0 : index
    %c0_0 = arith.constant 0 : index
    %0 = vector.load %arg1[%c0, %c0_0] : memref<16x32xf32, #tpu.memory_space<vmem>>, vector<16x32xf32>
    %c0_1 = arith.constant 0 : index
    %c0_2 = arith.constant 0 : index
    %1 = vector.load %arg2[%c0_1, %c0_2] : memref<32x128xf32, #tpu.memory_space<vmem>>, vector<32x128xf32>
    %cst = arith.constant dense<0.000000e+00> : vector<16x128xf32>
    %2 = tpu.matmul %0, %1, %cst {dimension_numbers = #tpu.dot_dimension_numbers<[1], [0], [0], [1], [0, 0, 1, 1], [], []>} : vector<16x32xf32>, vector<32x128xf32>, vector<16x128xf32> -> vector<16x128xf32>
    %c0_3 = arith.constant 0 : index
    %c0_4 = arith.constant 0 : index
    %3 = vector.load %arg3[%c0_3, %c0_4] : memref<1x128xf32, #tpu.memory_space<vmem>>, vector<1x128xf32>
    %4 = vector.broadcast %3 : vector<1x128xf32> to vector<16x128xf32>
    %5 = arith.addf %2, %4 : vector<16x128xf32>
    %cst_5 = arith.constant 5.000000e-01 : f32
    %6 = vector.broadcast %cst_5 : f32 to vector<16x128xf32>
    %7 = arith.mulf %6, %5 : vector<16x128xf32>
    %cst_6 = arith.constant 0.707106769 : f32
    %8 = vector.broadcast %cst_6 : f32 to vector<16x128xf32>
    %9 = arith.mulf %5, %8 : vector<16x128xf32>
    %10 = math.erf %9 : vector<16x128xf32>
    %cst_7 = arith.constant 1.000000e+00 : f32
    %11 = vector.broadcast %cst_7 : f32 to vector<16x128xf32>
    %12 = arith.addf %11, %10 : vector<16x128xf32>
    %13 = arith.mulf %7, %12 : vector<16x128xf32>
    %c0_8 = arith.constant 0 : index
    %c0_9 = arith.constant 0 : index
    %14 = vector.load %arg4[%c0_8, %c0_9] : memref<128x128xf32, #tpu.memory_space<vmem>>, vector<128x128xf32>
    %cst_10 = arith.constant dense<0.000000e+00> : vector<16x128xf32>
    %15 = tpu.matmul %13, %14, %cst_10 {dimension_numbers = #tpu.dot_dimension_numbers<[1], [0], [0], [1], [0, 0, 1, 1], [], []>} : vector<16x128xf32>, vector<128x128xf32>, vector<16x128xf32> -> vector<16x128xf32>
    %c0_11 = arith.constant 0 : index
    %c0_12 = arith.constant 0 : index
    %16 = vector.load %arg5[%c0_11, %c0_12] : memref<1x128xf32, #tpu.memory_space<vmem>>, vector<1x128xf32>
    %17 = vector.broadcast %16 : vector<1x128xf32> to vector<16x128xf32>
    %18 = arith.addf %15, %17 : vector<16x128xf32>
    %c0_13 = arith.constant 0 : index
    %c0_14 = arith.constant 0 : index
    %19 = vector.load %arg6[%c0_13, %c0_14] : memref<16x128xf32, #tpu.memory_space<vmem>>, vector<16x128xf32>
    tpu.vector_store %arg6[%c0_13, %c0_14], %18 {strides = array<i32>} : memref<16x128xf32, #tpu.memory_space<vmem>>, vector<16x128xf32>,
    return
  }
  func.func @transform_0(%arg0: i32) -> (i32, i32) {
    %c0_i32 = arith.constant 0 : i32
    %c0_i32_0 = arith.constant 0 : i32
    return %arg0, %c0_i32 : i32, i32
  }
  func.func @transform_1(%arg0: i32) -> (i32, i32) {
    %c0_i32 = arith.constant 0 : i32
    %c0_i32_0 = arith.constant 0 : i32
    %c0_i32_1 = arith.constant 0 : i32
    return %c0_i32, %c0_i32_0 : i32, i32
  }
  func.func @transform_2(%arg0: i32) -> (i32, i32) {
    %c0_i32 = arith.constant 0 : i32
    %c0_i32_0 = arith.constant 0 : i32
    %c0_i32_1 = arith.constant 0 : i32
    return %c0_i32, %c0_i32_0 : i32, i32
  }
  func.func @transform_3(%arg0: i32) -> (i32, i32) {
    %c0_i32 = arith.constant 0 : i32
    %c0_i32_0 = arith.constant 0 : i32
    %c0_i32_1 = arith.constant 0 : i32
    return %c0_i32, %c0_i32_0 : i32, i32
  }
  func.func @transform_4(%arg0: i32) -> (i32, i32) {
    %c0_i32 = arith.constant 0 : i32
    %c0_i32_0 = arith.constant 0 : i32
    %c0_i32_1 = arith.constant 0 : i32
    return %c0_i32, %c0_i32_0 : i32, i32
  }
  func.func @transform_5(%arg0: i32) -> (i32, i32) {
    %c0_i32 = arith.constant 0 : i32
    %c0_i32_0 = arith.constant 0 : i32
    return %arg0, %c0_i32 : i32, i32
  }
}

</mosaic_0001>

<bundles_post_ra>
// kernel: tpu_custom_call.1
= control target key start
LH: loop header
LB: loop body
LE: loop exit
PB: predicated region body
PF: predicated region fallthrough
CT: control target
= control target key end

     0   :  { %10 = vsyncpa [#allocation3], 0  ;;  %s523_s0 = inlined_call_operand.hbm [shape: f32[16,32], index: 0, kind: input, shape index: {}]   ;;  %s524_s1 = inlined_call_operand.hbm [shape: f32[32,128], index: 1, kind: input, shape index: {}]   ;;  %s525_s2 = inlined_call_operand.vmem [shape: f32[1,128], index: 2, kind: input, shape index: {}]   ;;  %s526_s3 = inlined_call_operand.hbm [shape: f32[128,128], index: 3, kind: input, shape index: {}]   ;;  %s527_s4 = inlined_call_operand.vmem [shape: f32[1,128], index: 4, kind: input, shape index: {}]   ;;  %s528_s5 = inlined_call_operand.hbm [shape: f32[16,128], index: 5, kind: output, shape index: {}]  }
   0x1   :  { %11 = vsyncpa [#allocation6], 0 }
   0x2   :  { %12 = vsyncpa [#allocation4], 0  ;;  %s455_s18 = smov [#allocation5]   ;;  %s456_s20 = smov [#allocation2]  }
   0x3   :  { %s30_s19 = sshll.u32 %s455_s18, 4  ;;  %s18_s21 = sshll.u32 %s456_s20, 4  ;;  %s31_s19 = int_to_ptr.vmem [resolvable:$true] %s30_s19  ;;  %s19_s21 = int_to_ptr.vmem [resolvable:$true] %s18_s21 }
   0x4   :  { %s377_s22 = scalar_lea.vmem %s31_s19, 512  ;;  %p382_p1 = scmp.lt.s32.totalorder %s31_s19, %s31_s19 }
   0x5   :  { %p378_p0 = scmp.ne.s32.totalorder %s31_s19, %s377_s22  ;;  %p383_p2 = scmp.lt.s32.totalorder %s377_s22, %s377_s22 }
   0x7   :  { %p384_p3 = por %p383_p2, %p382_p1 }
   0x9   :  { %p385_p4 = pnand %p384_p3, %p378_p0 }
   0xb   :  { %388 = shalt.err (!%p385_p4)
}
   0xc   :  { %s457_s23 = smov 128   ;;  %s458_s24 = smov 8  }
   0xd   :  { %36 = dma.hbm_to_vmem [thread:$0]  %s524_s1, 512, %s31_s19, [#allocation6], %s457_s23, %s457_s23, %s458_s24  }
   0xe   :  { %s397_s27 = scalar_lea.vmem %s19_s21, 256  ;;  %p402_p6 = scmp.lt.s32.totalorder %s19_s21, %s19_s21 }
   0xf   :  { %p398_p5 = scmp.ne.s32.totalorder %s19_s21, %s397_s27  ;;  %p403_p7 = scmp.lt.s32.totalorder %s397_s27, %s397_s27 }
  0x11   :  { %p404_p8 = por %p403_p7, %p402_p6 }
  0x13   :  { %p405_p9 = pnand %p404_p8, %p398_p5 }
  0x15   :  { %408 = shalt.err (!%p405_p9)
}
  0x16   :  { %24 = dma.hbm_to_vmem [thread:$0]  %s523_s0, 256, %s19_s21, [#allocation3], %s457_s23, %s457_s23, %s458_s24  }
  0x17   :  { %s459_s30 = smov [#allocation7]  }
  0x18   :  { %s44_s6 = sshll.u32 %s459_s30, 4  ;;  %s45_s6 = int_to_ptr.vmem [resolvable:$true] %s44_s6 }
  0x19   :  { %s417_s7 = scalar_lea.vmem %s45_s6, 2048  ;;  %p422_p11 = scmp.lt.s32.totalorder %s45_s6, %s45_s6 }
  0x1a   :  { %p418_p10 = scmp.ne.s32.totalorder %s45_s6, %s417_s7  ;;  %p423_p12 = scmp.lt.s32.totalorder %s417_s7, %s417_s7 }
  0x1c   :  { %p424_p13 = por %p423_p12, %p422_p11 }
  0x1e   :  { %p425_p0 = pnand %p424_p13, %p418_p10 }
  0x20   :  { %428 = shalt.err (!%p425_p0)
}
  0x21   :  { %50 = dma.hbm_to_vmem [thread:$0]  %s526_s3, 2048, %s45_s6, [#allocation6], %s457_s23, %s457_s23, %s458_s24  }
  0x22   :  { %449 = dma.done.wait [#allocation3], 256  }
  0x23   :  { %450 = vsyncadd [#allocation3], 4294967040 }
  0x24   :  { %451 = dma.done.wait [#allocation6], 2560  }
  0x25   :  { %452 = vsyncadd [#allocation6], 4294964736  ;;  %vm75_vm0 = vcmask 261120   ;;  %v67_v0 = vld [vmem:[#allocation5 + $0x18] sm:$0xff]  ;;  %v66_v1 = vld [vmem:[#allocation5 + $0x10] sm:$0xff]  ;;  %s460_s10 = smov [#allocation8]  }
  0x26   :  { %313 = vmatprep.subr.mxu0 %v67_v0  ;;  %v62_v2 = vld [vmem:[#allocation2] sm:$0xff]  ;;  %v65_v3 = vld [vmem:[#allocation5 + $0x8] sm:$0xff]  ;;  %v182_v4 = vld [vmem:[#allocation7 + $0x78] sm:$0xff]  ;;  %s272_s11 = sshll.u32 %s460_s10, 4  ;;  %s273_s11 = int_to_ptr.vmem [resolvable:$true] %s272_s11 }
  0x27   :  { %314 = vmatpush3.msra.mxu0 %v67_v0  ;;  %321 = vmatprep.mubr.msk.f32.mxu0 %vm75_vm0, %v62_v2  ;;  %v181_v5 = vld [vmem:[#allocation7 + $0x70] sm:$0xff]  ;;  %v64_v6 = vld [vmem:[#allocation5] sm:$0xff]  ;;  %v180_v7 = vld [vmem:[#allocation7 + $0x68] sm:$0xff]  ;;  %s429_s12 = scalar_lea.vmem %s273_s11, 256  ;;  %p434_p2 = scmp.lt.s32.totalorder %s273_s11, %s273_s11 }
  0x28   :  { %315 = vmatprep.subr.mxu0 %v66_v1  ;;  %324 = vmatprep.subr.mxu1 %v182_v4  ;;  %v63_v8 = vld [vmem:[#allocation2 + $0x8] sm:$0xff]  ;;  %v179_v9 = vld [vmem:[#allocation7 + $0x60] sm:$0xff]  ;;  %v177_v11 = vld [vmem:[#allocation7 + $0x50] sm:$0xff]  ;;  %p430_p1 = scmp.ne.s32.totalorder %s273_s11, %s429_s12  ;;  %p435_p3 = scmp.lt.s32.totalorder %s429_s12, %s429_s12 }
  0x29   :  { %316 = vmatpush3.msra.mxu0 %v66_v1  ;;  %325 = vmatpush3.msra.mxu1 %v182_v4  ;;  %v178_v10 = vld [vmem:[#allocation7 + $0x58] sm:$0xff]  ;;  %v176_v12 = vld [vmem:[#allocation7 + $0x48] sm:$0xff]  ;;  %v175_v13 = vld [vmem:[#allocation7 + $0x40] sm:$0xff] }
  0x2a   :  { %317 = vmatprep.subr.mxu0 %v65_v3  ;;  %326 = vmatprep.subr.mxu1 %v181_v5  ;;  %v174_v14 = vld [vmem:[#allocation7 + $0x38] sm:$0xff]  ;;  %v173_v15 = vld [vmem:[#allocation7 + $0x30] sm:$0xff]  ;;  %v172_v16 = vld [vmem:[#allocation7 + $0x28] sm:$0xff]  ;;  %p436_p4 = por %p435_p3, %p434_p2 }
  0x2b   :  { %318 = vmatpush3.msra.mxu0 %v65_v3  ;;  %327 = vmatpush3.msra.mxu1 %v181_v5  ;;  %v171_v17 = vld [vmem:[#allocation7 + $0x20] sm:$0xff]  ;;  %v170_v18 = vld [vmem:[#allocation7 + $0x18] sm:$0xff]  ;;  %v169_v19 = vld [vmem:[#allocation7 + $0x10] sm:$0xff] }
  0x2c   :  { %319 = vmatprep.subr.mxu0 %v64_v6  ;;  %328 = vmatprep.subr.mxu1 %v180_v7  ;;  %v168_v20 = vld [vmem:[#allocation7 + $0x8] sm:$0xff]  ;;  %v167_v21 = vld [vmem:[#allocation7] sm:$0xff]  ;;  %v285_v22 = vld [vmem:[%s525_s2] ss:$0 sm:$0xff]  ;;  %p437_p5 = pnand %p436_p4, %p430_p1 }
  0x2d   :  { %320 = vmatpush3.msra.mxu0 %v64_v6  ;;  %329 = vmatpush3.msra.mxu1 %v180_v7  ;;  %v288_v37 = vld [vmem:[%s527_s4] ss:$0 sm:$0xff] }
  0x2e   :  { %322 = vmatmul.mubr.msk.f32.vlgmr.msra.gmra.mxu0 %vm75_vm0, %v63_v8  ;;  %330 = vmatprep.subr.mxu1 %v179_v9 }
  0x2f   :  { %331 = vmatpush3.msra.mxu1 %v179_v9 }
  0x30   :  { %332 = vmatprep.subr.mxu1 %v178_v10 }
  0x31   :  { %333 = vmatpush3.msra.mxu1 %v178_v10 }
  0x32   :  { %334 = vmatprep.subr.mxu1 %v177_v11 }
  0x33   :  { %335 = vmatpush3.msra.mxu1 %v177_v11 }
  0x34   :  { %336 = vmatprep.subr.mxu1 %v176_v12 }
  0x35   :  { %337 = vmatpush3.msra.mxu1 %v176_v12 }
  0x36   :  { %338 = vmatprep.subr.mxu1 %v175_v13 }
  0x37   :  { %339 = vmatpush3.msra.mxu1 %v175_v13 }
  0x38   :  { %340 = vmatprep.subr.mxu1 %v174_v14 }
  0x39   :  { %341 = vmatpush3.msra.mxu1 %v174_v14 }
  0x3a   :  { %342 = vmatprep.subr.mxu1 %v173_v15 }
  0x3b   :  { %343 = vmatpush3.msra.mxu1 %v173_v15 }
  0x3c   :  { %344 = vmatprep.subr.mxu1 %v172_v16 }
  0x3d   :  { %345 = vmatpush3.msra.mxu1 %v172_v16 }
  0x3e   :  { %346 = vmatprep.subr.mxu1 %v171_v17 }
  0x3f   :  { %347 = vmatpush3.msra.mxu1 %v171_v17 }
  0x40   :  { %348 = vmatprep.subr.mxu1 %v170_v18 }
  0x41   :  { %349 = vmatpush3.msra.mxu1 %v170_v18 }
  0x42   :  { %350 = vmatprep.subr.mxu1 %v169_v19 }
  0x43   :  { %351 = vmatpush3.msra.mxu1 %v169_v19 }
  0x44   :  { %352 = vmatprep.subr.mxu1 %v168_v20 }
  0x45   :  { %353 = vmatpush3.msra.mxu1 %v168_v20 }
  0x46   :  { %354 = vmatprep.subr.mxu1 %v167_v21 }
  0x47   :  { %355 = vmatpush3.msra.mxu1 %v167_v21 }
  0xee   :  { %v323_v23 = vpop.f32.mrf.mxu0 }
  0xef   :  { %v154_v24 = vadd.f32 %v323_v23, %v285_v22 }
  0xf0   :  { %v148_v25 = vpop.f32.mrf.mxu0 }
  0xf1   :  { %v160_v26 = vmul.f32 0.70710677, %v154_v24  ;;  %v149_v27 = vadd.f32 %v285_v22, %v148_v25  ;;  %v158_v34 = vmul.f32 0.5, %v154_v24 }
  0xf3   :  { %365 = verf.f32 %v160_v26  ;;  %v159_v28 = vmul.f32 0.70710677, %v149_v27  ;;  %v157_v32 = vmul.f32 0.5, %v149_v27 }
  0xf5   :  { %367 = verf.f32 %v159_v28 }
 0x100   :  { %v366_v29 = vpop.eup %365 }
 0x101   :  { %v164_v31 = vadd.f32 1.0, %v366_v29 }
 0x102   :  { %v368_v30 = vpop.eup %367 }
 0x103   :  { %v163_v33 = vadd.f32 1.0, %v368_v30  ;;  %v166_v36 = vmul.f32 %v164_v31, %v158_v34 }
 0x105   :  { %v165_v35 = vmul.f32 %v163_v33, %v157_v32 }
 0x107   :  { %356 = vmatprep.mubr.f32.mxu1 %v165_v35 }
 0x108   :  { %357 = vmatmul.mubr.f32.vlgmr.msra.gmra.mxu1 %v166_v36 }
 0x1c8   :  { %v358_v38 = vpop.f32.mrf.mxu1 }
 0x1c9   :  { %v262_v39 = vadd.f32 %v358_v38, %v288_v37 }
 0x1ca   :  { %v256_v40 = vpop.f32.mrf.mxu1 }
 0x1cb   :  { %266 = vst [vmem:[#allocation8 + $0x8] sm:$0xff] %v262_v39  ;;  %v257_v41 = vadd.f32 %v288_v37, %v256_v40 }
 0x1cd   :  { %265 = vst [vmem:[#allocation8] sm:$0xff] %v257_v41 }
 0x1ce   :  { %440 = shalt.err (!%p437_p5)
}
 0x1cf   :  { %278 = dma.vmem_to_hbm [thread:$0]  %s273_s11, 256, %s528_s5, [#allocation4], %s457_s23, %s457_s23, %s458_s24  }
 0x1d0   :  { %453 = dma.done.wait [#allocation4], 256  }
 0x1d1   :  { %454 = vsyncadd [#allocation4], 4294967040 }
 0x1d2   :  { %282 = vsyncpa [#allocation3], 1 }
 0x1d3   :  { %283 = vsyncpa [#allocation6], 1 }
 0x1d4   :  { %284 = vsyncpa [#allocation4], 1 }

</bundles_post_ra>
